<compile_context>
chip_gen: v7x
topology: tpu7x:2x2x1
jax: 0.10.0
libtpu: 0.0.40
codegen_flags: <defaults>
</compile_context>

<pallas_src>
import jax
import jax.numpy as jnp
from jax import lax
from jax.experimental import pallas as pl
from jax.experimental.pallas import tpu as pltpu


# ---------------------------------------------------------------------------
# Shared in-kernel helper: all prefix log-softmaxes in one vectorized pass.
#   s: (tile_k, L) float32
#   returns (L-1, tile_k, L): row p holds log_softmax over the first p+2
#   columns of s, padded with -inf beyond the prefix length.
# ---------------------------------------------------------------------------
def _prefix_log_softmax(s):
    tk, L = s.shape
    shape3 = (L - 1, tk, L)
    # Build the mask from 2-D iotas (lane / second-minor), then sublane-broadcast.
    col2 = lax.broadcasted_iota(jnp.int32, (L - 1, L), 1)      # column index
    pre2 = lax.broadcasted_iota(jnp.int32, (L - 1, L), 0) + 2  # prefix length
    mask = jnp.broadcast_to((col2 < pre2)[:, None, :], shape3)  # (L-1, tk, L)

    sb = jnp.broadcast_to(s[None, :, :], shape3)
    neg_inf = jnp.float32(-jnp.inf)
    xm = jnp.where(mask, sb, neg_inf)
    m = jnp.max(xm, axis=2, keepdims=True)                      # (L-1, tk, 1)
    e = jnp.where(mask, jnp.exp(sb - m), 0.0)
    lse = m + jnp.log(jnp.sum(e, axis=2, keepdims=True))        # (L-1, tk, 1)
    return jnp.where(mask, sb - lse, neg_inf)


# ---------------------------------------------------------------------------
# Fused kernel: len_decoder Linear + all prefix log-softmaxes.
# ---------------------------------------------------------------------------
def _length_fused_kernel(x_ref, w_ref, b_ref, scores_ref, prefix_ref):
    # x: (tile_k, 2A), w: (2A, L), b: (1, L)
    s = (
        jnp.dot(x_ref[...], w_ref[...], preferred_element_type=jnp.float32)
        + b_ref[...]
    )
    scores_ref[...] = s
    prefix_ref[...] = _prefix_log_softmax(s)


# Prefix-only kernel (used for the unif_lenps path, where len_scores is a
# fixed parameter and there is no Linear to fuse with).
def _prefix_only_kernel(s_ref, prefix_ref):
    prefix_ref[...] = _prefix_log_softmax(s_ref[...])


def _pick_tile_k(K_total):
    # Single block for small problems; MXU-native 256-row tiles (multiple of
    # 8 -> legal sublane blocking) once K_total scales up.
    return K_total if K_total <= 256 else 256


def length_fused_pallas(state_embs, w, b):
    K_total, two_a = state_embs.shape
    L = w.shape[1]
    tile_k = _pick_tile_k(K_total)
    grid = (pl.cdiv(K_total, tile_k),)
    return pl.pallas_call(
        _length_fused_kernel,
        grid=grid,
        out_shape=(
            jax.ShapeDtypeStruct((K_total, L), jnp.float32),
            jax.ShapeDtypeStruct((L - 1, K_total, L), jnp.float32),
        ),
        in_specs=[
            pl.BlockSpec((tile_k, two_a), lambda i: (i, 0)),
            pl.BlockSpec((two_a, L), lambda i: (0, 0)),
            pl.BlockSpec((1, L), lambda i: (0, 0)),
        ],
        out_specs=(
            pl.BlockSpec((tile_k, L), lambda i: (i, 0)),
            pl.BlockSpec((L - 1, tile_k, L), lambda i: (0, i, 0)),
        ),
        compiler_params=pltpu.CompilerParams(
            dimension_semantics=("parallel",),
        ),
    )(state_embs, w, b)


def prefix_log_softmax_pallas(len_scores):
    K_total, L = len_scores.shape
    tile_k = _pick_tile_k(K_total)
    grid = (pl.cdiv(K_total, tile_k),)
    return pl.pallas_call(
        _prefix_only_kernel,
        grid=grid,
        out_shape=jax.ShapeDtypeStruct((L - 1, K_total, L), jnp.float32),
        in_specs=[pl.BlockSpec((tile_k, L), lambda i: (i, 0))],
        out_specs=pl.BlockSpec((L - 1, tile_k, L), lambda i: (0, i, 0)),
        compiler_params=pltpu.CompilerParams(
            dimension_semantics=("parallel",),
        ),
    )(len_scores)


# ---------------------------------------------------------------------------
# Python wrapper mirroring Length.forward()
# ---------------------------------------------------------------------------
def length_forward(params, K, Kmul, L, unif_lenps):
    K_total = K * Kmul
    A_from, A_to = params["A_from"], params["A_to"]
    # glue: concat in plain JAX
    state_embs = jnp.concatenate([A_from, A_to.T], axis=1)  # (K_total, 2*A_dim)

    if unif_lenps:
        len_scores = jnp.broadcast_to(
            params["len_scores"].astype(jnp.float32), (K_total, L)
        )
        prefix = prefix_log_softmax_pallas(len_scores)       # (L-1, K_total, L)
    else:
        len_scores, prefix = length_fused_pallas(
            state_embs, params["W"], params["b"]
        )

    # glue: slice the ragged list out of the slab; transpose here (not in-kernel)
    lplist = [jnp.zeros((1, K_total), jnp.float32)]
    for l in range(2, L + 1):
        lplist.append(prefix[l - 2, :, :l].T)                 # (l, K_total)
    return lplist, len_scores


# ---------------------------------------------------------------------------
if __name__ == "__main__":
    # small, module-consistent shapes
    K, Kmul, A_dim, L = 4, 2, 16, 8
    K_total = K * Kmul

    key = jax.random.PRNGKey(0)
    k1, k2, k3, k4 = jax.random.split(key, 4)
    params = {
        "A_from": jax.random.normal(k1, (K_total, A_dim), jnp.float32),
        "A_to": jax.random.normal(k2, (A_dim, K_total), jnp.float32),
        # nn.Linear(2*A_dim, L): store W pre-transposed as (2*A_dim, L)
        "W": jax.random.normal(k3, (2 * A_dim, L), jnp.float32) * 0.1,
        "b": jax.random.normal(k4, (1, L), jnp.float32) * 0.1,
        "len_scores": jnp.ones((1, L), jnp.float32),  # used if unif_lenps
    }

    # --- learned-length path (fused Linear + prefix log-softmax kernel) ----
    lplist, len_scores = length_forward(params, K, Kmul, L, unif_lenps=False)
    jax.block_until_ready(len_scores)
    for t in lplist:
        jax.block_until_ready(t)

    state_embs = jnp.concatenate([params["A_from"], params["A_to"].T], axis=1)
    ref_scores = state_embs @ params["W"] + params["b"]
    assert jnp.allclose(len_scores, ref_scores, atol=1e-5), "linear mismatch"
    assert lplist[0].shape == (1, K_total)
    for l in range(2, L + 1):
        ref = jax.nn.log_softmax(ref_scores[:, :l], axis=1).T
        assert jnp.allclose(lplist[l - 1], ref, atol=1e-5), f"lsm mismatch l={l}"

    # --- uniform-length path (prefix-only kernel) ---------------------------
    lplist_u, len_scores_u = length_forward(params, K, Kmul, L, unif_lenps=True)
    jax.block_until_ready(len_scores_u)
    ref_scores_u = jnp.broadcast_to(params["len_scores"], (K_total, L))
    assert jnp.allclose(len_scores_u, ref_scores_u, atol=1e-5)
    for l in range(2, L + 1):
        ref = jax.nn.log_softmax(ref_scores_u[:, :l], axis=1).T
        assert jnp.allclose(lplist_u[l - 1], ref, atol=1e-5), f"unif mismatch l={l}"

    print("KERNEL_OK")
</pallas_src>

<mosaic_0001>
module attributes {stable_mosaic.version = 11 : i64} {
  func.func @_length_fused_kernel(%arg0: i32, %arg1: memref<8x32xf32, #tpu.memory_space<vmem>>, %arg2: memref<32x8xf32, #tpu.memory_space<vmem>>, %arg3: memref<1x8xf32, #tpu.memory_space<vmem>>, %arg4: memref<8x8xf32, #tpu.memory_space<vmem>>, %arg5: memref<7x8x8xf32, #tpu.memory_space<vmem>>) attributes {dimension_semantics = [#tpu.dimension_semantics<parallel>], iteration_bounds = array<i64: 1>, scalar_prefetch = 0 : i64, scratch_operands = 0 : i64, tpu.core_type = #tpu.core_type<tc>, window_params = [{transform_indices = @transform_0, window_bounds = array<i64: 8, 32>}, {pipeline_mode = #tpu.pipeline_mode<synchronous>, transform_indices = @transform_1, window_bounds = array<i64: 32, 8>}, {pipeline_mode = #tpu.pipeline_mode<synchronous>, transform_indices = @transform_2, window_bounds = array<i64: 1, 8>}, {transform_indices = @transform_3, window_bounds = array<i64: 8, 8>}, {transform_indices = @transform_4, window_bounds = array<i64: 7, 8, 8>}]} {
    %c0 = arith.constant 0 : index
    %c0_0 = arith.constant 0 : index
    %0 = vector.load %arg1[%c0, %c0_0] : memref<8x32xf32, #tpu.memory_space<vmem>>, vector<8x32xf32>
    %c0_1 = arith.constant 0 : index
    %c0_2 = arith.constant 0 : index
    %1 = vector.load %arg2[%c0_1, %c0_2] : memref<32x8xf32, #tpu.memory_space<vmem>>, vector<32x8xf32>
    %cst = arith.constant dense<0.000000e+00> : vector<8x8xf32>
    %2 = tpu.matmul %0, %1, %cst {dimension_numbers = #tpu.dot_dimension_numbers<[1], [0], [0], [1], [0, 0, 1, 1], [], []>} : vector<8x32xf32>, vector<32x8xf32>, vector<8x8xf32> -> vector<8x8xf32>
    %c0_3 = arith.constant 0 : index
    %c0_4 = arith.constant 0 : index
    %3 = vector.load %arg3[%c0_3, %c0_4] : memref<1x8xf32, #tpu.memory_space<vmem>>, vector<1x8xf32>
    %4 = vector.broadcast %3 : vector<1x8xf32> to vector<8x8xf32>
    %5 = arith.addf %2, %4 : vector<8x8xf32>
    %c0_5 = arith.constant 0 : index
    %c0_6 = arith.constant 0 : index
    %6 = vector.load %arg4[%c0_5, %c0_6] : memref<8x8xf32, #tpu.memory_space<vmem>>, vector<8x8xf32>
    tpu.vector_store %arg4[%c0_5, %c0_6], %5 {strides = array<i32>} : memref<8x8xf32, #tpu.memory_space<vmem>>, vector<8x8xf32>,
    %7 = tpu.iota {dimensions = array<i32: 1>} : vector<7x8xi32>
    %8 = tpu.iota {dimensions = array<i32: 0>} : vector<7x8xi32>
    %c2_i32 = arith.constant 2 : i32
    %9 = vector.broadcast %c2_i32 : i32 to vector<7x8xi32>
    %10 = arith.addi %8, %9 : vector<7x8xi32>
    %11 = arith.cmpi slt, %7, %10 : vector<7x8xi32>
    %12 = vector.shape_cast %11 : vector<7x8xi1> to vector<7x1x8xi1>
    %13 = vector.shape_cast %12 : vector<7x1x8xi1> to vector<7x1x8xi1>
    %14 = vector.broadcast %13 : vector<7x1x8xi1> to vector<7x8x8xi1>
    %15 = vector.shape_cast %5 : vector<8x8xf32> to vector<1x8x8xf32>
    %16 = vector.shape_cast %15 : vector<1x8x8xf32> to vector<1x8x8xf32>
    %17 = vector.broadcast %16 : vector<1x8x8xf32> to vector<7x8x8xf32>
    %cst_7 = arith.constant 0xFF800000 : f32
    %18 = vector.broadcast %cst_7 : f32 to vector<7x8x8xf32>
    %19 = arith.select %14, %17, %18 : vector<7x8x8xi1>, vector<7x8x8xf32>
    %cst_8 = arith.constant dense<0xFF800000> : vector<7x8xf32>
    %20 = vector.multi_reduction <maximumf>, %19, %cst_8 [2] : vector<7x8x8xf32> to vector<7x8xf32>
    %21 = vector.shape_cast %20 : vector<7x8xf32> to vector<7x8x1xf32>
    %22 = vector.broadcast %21 : vector<7x8x1xf32> to vector<7x8x8xf32>
    %23 = arith.subf %17, %22 : vector<7x8x8xf32>
    %24 = math.exp %23 : vector<7x8x8xf32>
    %cst_9 = arith.constant 0.000000e+00 : f32
    %25 = vector.broadcast %cst_9 : f32 to vector<7x8x8xf32>
    %26 = arith.select %14, %24, %25 : vector<7x8x8xi1>, vector<7x8x8xf32>
    %cst_10 = arith.constant dense<0.000000e+00> : vector<7x8xf32>
    %27 = vector.multi_reduction <add>, %26, %cst_10 [2] : vector<7x8x8xf32> to vector<7x8xf32>
    %28 = vector.shape_cast %27 : vector<7x8xf32> to vector<7x8x1xf32>
    %29 = math.log %28 : vector<7x8x1xf32>
    %30 = arith.addf %21, %29 : vector<7x8x1xf32>
    %31 = vector.broadcast %30 : vector<7x8x1xf32> to vector<7x8x8xf32>
    %32 = arith.subf %17, %31 : vector<7x8x8xf32>
    %cst_11 = arith.constant 0xFF800000 : f32
    %33 = vector.broadcast %cst_11 : f32 to vector<7x8x8xf32>
    %34 = arith.select %14, %32, %33 : vector<7x8x8xi1>, vector<7x8x8xf32>
    %c0_12 = arith.constant 0 : index
    %c0_13 = arith.constant 0 : index
    %c0_14 = arith.constant 0 : index
    %35 = vector.load %arg5[%c0_12, %c0_13, %c0_14] : memref<7x8x8xf32, #tpu.memory_space<vmem>>, vector<7x8x8xf32>
    tpu.vector_store %arg5[%c0_12, %c0_13, %c0_14], %34 {strides = array<i32>} : memref<7x8x8xf32, #tpu.memory_space<vmem>>, vector<7x8x8xf32>,
    return
  }
  func.func @transform_0(%arg0: i32) -> (i32, i32) {
    %c0_i32 = arith.constant 0 : i32
    %c0_i32_0 = arith.constant 0 : i32
    return %arg0, %c0_i32 : i32, i32
  }
  func.func @transform_1(%arg0: i32) -> (i32, i32) {
    %c0_i32 = arith.constant 0 : i32
    %c0_i32_0 = arith.constant 0 : i32
    %c0_i32_1 = arith.constant 0 : i32
    return %c0_i32, %c0_i32_0 : i32, i32
  }
  func.func @transform_2(%arg0: i32) -> (i32, i32) {
    %c0_i32 = arith.constant 0 : i32
    %c0_i32_0 = arith.constant 0 : i32
    %c0_i32_1 = arith.constant 0 : i32
    return %c0_i32, %c0_i32_0 : i32, i32
  }
  func.func @transform_3(%arg0: i32) -> (i32, i32) {
    %c0_i32 = arith.constant 0 : i32
    %c0_i32_0 = arith.constant 0 : i32
    return %arg0, %c0_i32 : i32, i32
  }
  func.func @transform_4(%arg0: i32) -> (i32, i32, i32) {
    %c0_i32 = arith.constant 0 : i32
    %c0_i32_0 = arith.constant 0 : i32
    %c0_i32_1 = arith.constant 0 : i32
    return %c0_i32, %arg0, %c0_i32_0 : i32, i32, i32
  }
}

</mosaic_0001>

<bundles_post_ra>
// kernel: tpu_custom_call.1
= control target key start
LH: loop header
LB: loop body
LE: loop exit
PB: predicated region body
PF: predicated region fallthrough
CT: control target
= control target key end

     0   :  { %10 = vsyncpa [#allocation3], 0  ;;  %v468_v3 = vmov 0.0|0.0   ;;  %vm469_vm0 = vmmov 0   ;;  %v470_v6 = vmov 0.0   ;;  %s688_s0 = inlined_call_operand.vmem [shape: f32[8,32], index: 0, kind: input, shape index: {}]   ;;  %s689_s1 = inlined_call_operand.vmem [shape: f32[32,8], index: 1, kind: input, shape index: {}]   ;;  %s690_s2 = inlined_call_operand.vmem [shape: f32[1,8], index: 2, kind: input, shape index: {}]   ;;  %s691_s3 = inlined_call_operand.hbm [shape: f32[8,8], index: 3, kind: output, shape index: {0}]   ;;  %s692_s4 = inlined_call_operand.hbm [shape: f32[7,8,8], index: 4, kind: output, shape index: {1}]  }
   0x1   :  { %v19_v0 = vld [vmem:[%s689_s1] sm:$0xff]  ;;  %v20_v1 = vld [vmem:[%s689_s1 + $0x8] sm:$0xff]  ;;  %v21_v2 = vld [vmem:[%s689_s1 + $0x10] sm:$0xff]  ;;  %377 = vmatprep.subr.bf16.mxu0 %v468_v3  ;;  %374 = vmatprep.mubr.msk.f32.mxu0 %vm469_vm0, %v470_v6 }
   0x2   :  { %v378_v4 = vpack.c.bf16 %v20_v1, %v19_v0  ;;  %v22_v5 = vld [vmem:[%s689_s1 + $0x18] sm:$0xff] }
   0x3   :  { %11 = vsyncpa [#allocation5], 0  ;;  %v381_v7 = vpack.c.bf16 %v22_v5, %v21_v2  ;;  %v18_v8 = vld [vmem:[%s688_s0] sm:$0xff]  ;;  %vm30_vm1 = vcmask 261120   ;;  %v106_v9 = vlaneseq  ;;  %v471_v11 = vmov 1966171168  }
   0x4   :  { %379 = vmatpush3.bf16.msra.mxu0 %v378_v4  ;;  %v115_v12 = vunpack.c.l.s4 %v471_v11  ;;  %v472_v17 = vmov 0   ;;  %v359_v38 = vld [vmem:[%s690_s2] ss:$0 sm:$0xff]  ;;  %vm104_vm9 = vcmask 64512   ;;  %s473_s2 = smov [#allocation2]  }
   0x5   :  { %380 = vmatprep.subr.bf16.mxu0 %v468_v3  ;;  %v109_v10 = vshrl.u32 %v106_v9, 7  ;;  %v107_v13 = vand.u32 127, %v106_v9  ;;  %s335_s25 = sshll.u32 %s473_s2, 4  ;;  %s336_s25 = int_to_ptr.vmem [resolvable:$true] %s335_s25 }
   0x6   :  { %v116_v15 = vunpack.c.0.s8 %v115_v12  ;;  %s420_s26 = scalar_lea.vmem %s336_s25, 128  ;;  %p425_p1 = scmp.lt.s32.totalorder %s336_s25, %s336_s25 }
   0x7   :  { %v110_v14 = vadd.s32 2, %v109_v10  ;;  %v177_v28 = vsub.s32 0, %v109_v10  ;;  %p421_p0 = scmp.ne.s32.totalorder %s336_s25, %s420_s26  ;;  %p426_p2 = scmp.lt.s32.totalorder %s420_s26, %s420_s26 }
   0x8   :  { %382 = vmatpush3.bf16.msra.mxu0 %v381_v7  ;;  %v119_v16 = vsub.s32 %v116_v15, %v109_v10 }
   0x9   :  { %vm111_vm2 = vcmp.lt.s32.totalorder %v107_v13, %v110_v14  ;;  %p427_p3 = por %p426_p2, %p425_p1 }
   0xa   :  { %v112_v18 = vsel %vm111_vm2, 1, %v472_v17 }
   0xb   :  { %375 = vmatmul.mubr.msk.f32.vlgmr.msra.gmra.mrb[0].mxu0 %vm30_vm1, %v18_v8  ;;  %v120_v19 = vrot.slane %v112_v18, %v119_v16  ;;  %v113_v20 = vcombine.high %v112_v18, %v112_v18  ;;  %p428_p4 = pnand %p427_p3, %p421_p0 }
   0xd   :  { %v128_v21 = vcombine.high %v120_v19, %v120_v19  ;;  %v136_v22 = vrot.slane %v120_v19, %v119_v16  ;;  %v127_v23 = vrot.slane %v113_v20, %v119_v16 }
   0xf   :  { %v150_v24 = vrot.slane %v128_v21, %v119_v16  ;;  %v158_v25 = vcombine.high %v136_v22, %v136_v22  ;;  %v129_v26 = vcombine.high %v127_v23, %v127_v23  ;;  %vm161_vm4 = vcmp.ne.s32.totalorder %v136_v22, 0 }
  0x10   :  { %v143_v31 = vrot.slane %v127_v23, %v119_v16  ;;  %v168_v32 = vsel %vm161_vm4, 1, %v472_v17 }
  0x11   :  { %v160_v27 = vcombine.high %v150_v24, %v150_v24  ;;  %vm163_vm3 = vcmp.ne.s32.totalorder %v158_v25, 0  ;;  %v157_v29 = vrot.slane %v129_v26, %v119_v16  ;;  %vm162_vm6 = vcmp.ne.s32.totalorder %v150_v24, 0 }
  0x12   :  { %v170_v30 = vsel %vm163_vm3, 1, %v472_v17  ;;  %v169_v35 = vsel %vm162_vm6, 1, %v472_v17  ;;  %v178_v36 = vrot.slane %v168_v32, %v177_v28  ;;  %vm165_vm8 = vcmp.ne.s32.totalorder %v143_v31, 0 }
  0x13   :  { %vm164_vm5 = vcmp.ne.s32.totalorder %v160_v27, 0  ;;  %v186_v33 = vrot.slane %v170_v30, %v177_v28  ;;  %vm166_vm7 = vcmp.ne.s32.totalorder %v157_v29, 0  ;;  %v159_v37 = vcombine.high %v143_v31, %v143_v31 }
  0x14   :  { %v171_v34 = vsel %vm164_vm5, 1, %v472_v17  ;;  %v182_v40 = vrot.slane %v169_v35, %v177_v28  ;;  %v173_v41 = vsel %vm166_vm7, 1, %v472_v17  ;;  %v172_v42 = vsel %vm165_vm8, 1, %v472_v17 }
  0x15   :  { %v190_v39 = vrot.slane %v171_v34, %v177_v28  ;;  %vm520_vm10 = vcmp.eq.s32.totalorder %v186_v33, 1  ;;  %vm524_vm11 = vcmp.eq.s32.totalorder %v178_v36, 1  ;;  %vm167_vm12 = vcmp.ne.s32.totalorder %v159_v37, 0 }
  0x16   :  { %vm534_vm14 = vcmp.eq.s32.totalorder %v182_v40, 1  ;;  %v198_v50 = vrot.slane %v173_v41, %v177_v28  ;;  %v194_v51 = vrot.slane %v172_v42, %v177_v28  ;;  %v174_v54 = vsel %vm167_vm12, 1, %v472_v17 }
  0x17   :  { %vm530_vm13 = vcmp.eq.s32.totalorder %v190_v39, 1  ;;  %v202_v61 = vrot.slane %v174_v54, %v177_v28 }
  0x18   :  { %vm554_vm15 = vcmp.eq.s32.totalorder %v198_v50, 1  ;;  %vm558_vm0 = vcmp.eq.s32.totalorder %v194_v51, 1 }
  0x19   :  { %vm570_vm1 = vcmp.eq.s32.totalorder %v202_v61, 1 }
  0xde   :  { %v100_v43 = vpop.f32.mrb[0].mxu0 }
  0xdf   :  { %v528_v46 = vadd.f32 %v359_v38, %v100_v43  ;;  %v376_v47 = vpop.f32.mrb[1].mxu0 }
  0xe1   :  { %v212_v52 = vsel %vm520_vm10, %v528_v46, -inf  ;;  %105 = vst.msk [vmem:[#allocation2] sm:$0xff] %vm104_vm9, %v528_v46  ;;  %v210_v53 = vsel %vm524_vm11, %v528_v46, -inf  ;;  %v213_v57 = vsel %vm530_vm13, %v528_v46, -inf  ;;  %v211_v58 = vsel %vm534_vm14, %v528_v46, -inf }
  0xe2   :  { %v223_v55 = vsel %vm104_vm9, %v212_v52, -inf  ;;  %v217_v56 = vsel %vm104_vm9, %v210_v53, -inf  ;;  %v226_v62 = vsel %vm104_vm9, %v213_v57, -inf  ;;  %v220_v63 = vsel %vm104_vm9, %v211_v58, -inf }
  0xe3   :  { %224 = vmax.xlane.f32.xlu1 %v223_v55  ;;  %218 = vmax.xlane.f32.xlu0 %v217_v56  ;;  %v215_v0 = vsel %vm554_vm15, %v528_v46, -inf  ;;  %v214_v1 = vsel %vm558_vm0, %v528_v46, -inf  ;;  %v216_v5 = vsel %vm570_vm1, %v528_v46, -inf }
  0xe4   :  { %v232_v3 = vsel %vm104_vm9, %v215_v0, -inf  ;;  %v229_v4 = vsel %vm104_vm9, %v214_v1, -inf  ;;  %v235_v6 = vsel %vm104_vm9, %v216_v5, -inf }
  0xe7   :  { %227 = vmax.xlane.f32.xlu1 %v226_v62  ;;  %221 = vmax.xlane.f32.xlu0 %v220_v63 }
  0xeb   :  { %233 = vmax.xlane.f32.xlu1 %v232_v3  ;;  %230 = vmax.xlane.f32.xlu0 %v229_v4 }
  0xef   :  { %236 = vmax.xlane.f32.xlu0 %v235_v6 }
 0x170   :  { %v580_v7 = vpop.xlane.xlu1 %224  ;;  %v582_v8 = vpop.xlane.xlu0 %218 }
 0x171   :  { %v240_v9 = vsub.f32 %v528_v46, %v580_v7  ;;  %v238_v10 = vsub.f32 %v528_v46, %v582_v8 }
 0x173   :  { %v249_v11 = vmul.f32 1.442695, %v240_v9  ;;  %v245_v12 = vmul.f32 1.442695, %v238_v10 }
 0x174   :  { %v588_v13 = vpop.xlane.xlu1 %227  ;;  %v590_v14 = vpop.xlane.xlu0 %221 }
 0x175   :  { %392 = vpow2.f32 %v249_v11  ;;  %v241_v15 = vsub.f32 %v528_v46, %v588_v13  ;;  %v239_v16 = vsub.f32 %v528_v46, %v590_v14 }
 0x176   :  { %394 = vpow2.f32 %v245_v12 }
 0x177   :  { %v251_v17 = vmul.f32 1.442695, %v241_v15  ;;  %v247_v18 = vmul.f32 1.442695, %v239_v16 }
 0x178   :  { %v596_v19 = vpop.xlane.xlu1 %233  ;;  %v598_v20 = vpop.xlane.xlu0 %230 }
 0x179   :  { %396 = vpow2.f32 %v251_v17  ;;  %v243_v21 = vsub.f32 %v528_v46, %v596_v19  ;;  %v242_v22 = vsub.f32 %v528_v46, %v598_v20 }
 0x17a   :  { %398 = vpow2.f32 %v247_v18 }
 0x17b   :  { %v255_v23 = vmul.f32 1.442695, %v243_v21  ;;  %v253_v24 = vmul.f32 1.442695, %v242_v22 }
 0x17c   :  { %v604_v25 = vpop.xlane.xlu0 %236 }
 0x17d   :  { %400 = vpow2.f32 %v255_v23  ;;  %v244_v26 = vsub.f32 %v528_v46, %v604_v25 }
 0x17e   :  { %402 = vpow2.f32 %v253_v24 }
 0x17f   :  { %v393_v27 = vpop.eup %392  ;;  %v257_v28 = vmul.f32 1.442695, %v244_v26 }
 0x180   :  { %v395_v29 = vpop.eup %394  ;;  %v261_v33 = vsel %vm520_vm10, %v393_v27, 0.0 }
 0x181   :  { %404 = vpow2.f32 %v257_v28  ;;  %v259_v30 = vsel %vm524_vm11, %v395_v29, 0.0  ;;  %v272_v36 = vsel %vm104_vm9, %v261_v33, 0.0 }
 0x182   :  { %v266_v31 = vsel %vm104_vm9, %v259_v30, 0.0 }
 0x183   :  { %v397_v32 = vpop.eup %396  ;;  %267 = vadd.xlane.f32.xlu1 %v266_v31 }
 0x184   :  { %v399_v34 = vpop.eup %398  ;;  %v262_v39 = vsel %vm530_vm13, %v397_v32, 0.0 }
 0x185   :  { %v260_v35 = vsel %vm534_vm14, %v399_v34, 0.0  ;;  %v275_v42 = vsel %vm104_vm9, %v262_v39, 0.0 }
 0x186   :  { %v269_v37 = vsel %vm104_vm9, %v260_v35, 0.0 }
 0x187   :  { %v401_v38 = vpop.eup %400  ;;  %273 = vadd.xlane.f32.xlu1 %v272_v36  ;;  %270 = vadd.xlane.f32.xlu0 %v269_v37 }
 0x188   :  { %v403_v40 = vpop.eup %402  ;;  %v264_v50 = vsel %vm554_vm15, %v401_v38, 0.0 }
 0x189   :  { %v263_v41 = vsel %vm558_vm0, %v403_v40, 0.0  ;;  %v281_v53 = vsel %vm104_vm9, %v264_v50, 0.0 }
 0x18a   :  { %v278_v43 = vsel %vm104_vm9, %v263_v41, 0.0 }
 0x18b   :  { %v405_v47 = vpop.eup %404  ;;  %276 = vadd.xlane.f32.xlu0 %v275_v42  ;;  %279 = vadd.xlane.f32.xlu1 %v278_v43 }
 0x18c   :  { %v265_v51 = vsel %vm570_vm1, %v405_v47, 0.0 }
 0x18d   :  { %v284_v52 = vsel %vm104_vm9, %v265_v51, 0.0 }
 0x18f   :  { %282 = vadd.xlane.f32.xlu0 %v281_v53  ;;  %285 = vadd.xlane.f32.xlu1 %v284_v52 }
 0x190   :  { %431 = shalt.err (!%p428_p4)
}
 0x191   :  { %s432_s29 = scalar_lea.hbm %s691_s3, 128 }
 0x192   :  { %p433_p5 = scmp.ne.s32.totalorder %s691_s3, %s432_s29  ;;  %p436_p6 = scmp.lt.u32.totalorder %s432_s29, %s691_s3 }
 0x194   :  { %p438_p7 = pnand %p436_p6, %p433_p5 }
 0x196   :  { %441 = shalt.err (!%p438_p7)
}
 0x197   :  { %338 = dma.vmem_to_hbm [thread:$0]  %s336_s25, 128, %s691_s3, [#allocation3]  }
 0x198   :  { %s474_s3 = smov [#allocation4]  }
 0x199   :  { %s344_s10 = sshll.u32 %s474_s3, 4  ;;  %s345_s10 = int_to_ptr.vmem [resolvable:$true] %s344_s10 }
 0x19a   :  { %s442_s11 = scalar_lea.vmem %s345_s10, 896  ;;  %p447_p9 = scmp.lt.s32.totalorder %s345_s10, %s345_s10 }
 0x19b   :  { %p443_p8 = scmp.ne.s32.totalorder %s345_s10, %s442_s11  ;;  %p448_p10 = scmp.lt.s32.totalorder %s442_s11, %s442_s11 }
 0x19d   :  { %p449_p11 = por %p448_p10, %p447_p9 }
 0x19f   :  { %p450_p12 = pnand %p449_p11, %p443_p8 }
 0x210   :  { %v268_v54 = vpop.xlane.xlu1 %267 }
 0x211   :  { %406 = vlog2.f32 %v268_v54 }
 0x214   :  { %v274_v55 = vpop.xlane.xlu1 %273  ;;  %v271_v56 = vpop.xlane.xlu0 %270 }
 0x215   :  { %408 = vlog2.f32 %v274_v55 }
 0x216   :  { %410 = vlog2.f32 %v271_v56 }
 0x218   :  { %v280_v57 = vpop.xlane.xlu1 %279  ;;  %v277_v58 = vpop.xlane.xlu0 %276 }
 0x219   :  { %412 = vlog2.f32 %v280_v57 }
 0x21a   :  { %414 = vlog2.f32 %v277_v58 }
 0x21b   :  { %v407_v61 = vpop.eup %406 }
 0x21c   :  { %v288_v62 = vmul.f32 0.6931472, %v407_v61  ;;  %v286_v63 = vpop.xlane.xlu1 %285  ;;  %v283_v0 = vpop.xlane.xlu0 %282 }
 0x21d   :  { %416 = vlog2.f32 %v286_v63 }
 0x21e   :  { %v301_v1 = vadd.f32 %v288_v62, %v582_v8  ;;  %418 = vlog2.f32 %v283_v0 }
 0x21f   :  { %v409_v3 = vpop.eup %408 }
 0x220   :  { %v411_v4 = vpop.eup %410  ;;  %v308_v5 = vsub.f32 %v528_v46, %v301_v1  ;;  %v292_v6 = vmul.f32 0.6931472, %v409_v3 }
 0x221   :  { %v290_v9 = vmul.f32 0.6931472, %v411_v4 }
 0x222   :  { %v315_v10 = vsel %vm524_vm11, %v308_v5, -inf  ;;  %v303_v11 = vadd.f32 %v292_v6, %v580_v7 }
 0x223   :  { %v413_v12 = vpop.eup %412  ;;  %322 = vst.msk [vmem:[#allocation4] sm:$0xff] %vm104_vm9, %v315_v10  ;;  %v302_v15 = vadd.f32 %v290_v9, %v590_v14 }
 0x224   :  { %v415_v16 = vpop.eup %414  ;;  %v310_v8 = vsub.f32 %v528_v46, %v303_v11  ;;  %v296_v17 = vmul.f32 0.6931472, %v413_v12 }
 0x225   :  { %v309_v18 = vsub.f32 %v528_v46, %v302_v15  ;;  %v294_v21 = vmul.f32 0.6931472, %v415_v16 }
 0x226   :  { %v317_v22 = vsel %vm520_vm10, %v310_v8, -inf  ;;  %v305_v45 = vadd.f32 %v296_v17, %v598_v20 }
 0x227   :  { %v417_v23 = vpop.eup %416  ;;  %324 = vst.msk [vmem:[#allocation4 + $0x10] sm:$0xff] %vm104_vm9, %v317_v22  ;;  %v316_v7 = vsel %vm534_vm14, %v309_v18, -inf  ;;  %v304_v14 = vadd.f32 %v294_v21, %v588_v13 }
 0x228   :  { %v419_v24 = vpop.eup %418  ;;  %323 = vst.msk [vmem:[#allocation4 + $0x8] sm:$0xff] %vm104_vm9, %v316_v7  ;;  %v312_v26 = vsub.f32 %v528_v46, %v305_v45  ;;  %v300_v27 = vmul.f32 0.6931472, %v417_v23 }
 0x229   :  { %v311_v28 = vsub.f32 %v528_v46, %v304_v14  ;;  %v298_v44 = vmul.f32 0.6931472, %v419_v24 }
 0x22a   :  { %v319_v20 = vsel %vm558_vm0, %v312_v26, -inf  ;;  %v307_v29 = vadd.f32 %v300_v27, %v604_v25 }
 0x22b   :  { %326 = vst.msk [vmem:[#allocation4 + $0x20] sm:$0xff] %vm104_vm9, %v319_v20  ;;  %v318_v49 = vsel %vm530_vm13, %v311_v28, -inf  ;;  %v306_v13 = vadd.f32 %v298_v44, %v596_v19 }
 0x22c   :  { %325 = vst.msk [vmem:[#allocation4 + $0x18] sm:$0xff] %vm104_vm9, %v318_v49  ;;  %v314_v30 = vsub.f32 %v528_v46, %v307_v29 }
 0x22d   :  { %v313_v31 = vsub.f32 %v528_v46, %v306_v13 }
 0x22e   :  { %v321_v60 = vsel %vm570_vm1, %v314_v30, -inf }
 0x22f   :  { %328 = vst.msk [vmem:[#allocation4 + $0x30] sm:$0xff] %vm104_vm9, %v321_v60  ;;  %v320_v25 = vsel %vm554_vm15, %v313_v31, -inf }
 0x230   :  { %327 = vst.msk [vmem:[#allocation4 + $0x28] sm:$0xff] %vm104_vm9, %v320_v25 }
 0x231   :  { %453 = shalt.err (!%p450_p12)
}
 0x232   :  { %s454_s14 = scalar_lea.hbm %s692_s4, 896 }
 0x233   :  { %p455_p13 = scmp.ne.s32.totalorder %s692_s4, %s454_s14  ;;  %p458_p0 = scmp.lt.u32.totalorder %s454_s14, %s692_s4 }
 0x235   :  { %p460_p1 = pnand %p458_p0, %p455_p13 }
 0x237   :  { %463 = shalt.err (!%p460_p1)
}
 0x238   :  { %s475_s19 = smov 128   ;;  %s476_s20 = smov 8  }
 0x239   :  { %350 = dma.vmem_to_hbm [thread:$0]  %s345_s10, 896, %s692_s4, [#allocation5], %s475_s19, %s475_s19, %s476_s20  }
 0x23a   :  { %464 = dma.done.wait [#allocation3], 128  }
 0x23b   :  { %465 = vsyncadd [#allocation3], 4294967168 }
 0x23c   :  { %466 = dma.done.wait [#allocation5], 896  }
 0x23d   :  { %467 = vsyncadd [#allocation5], 4294966400 }
 0x23e   :  { %357 = vsyncpa [#allocation3], 1 }
 0x23f   :  { %358 = vsyncpa [#allocation5], 1 }

</bundles_post_ra>
